<compile_context>
chip_gen: v7x
topology: tpu7x:2x2x1
jax: 0.10.0
libtpu: 0.0.40
codegen_flags: <defaults>
</compile_context>

<pallas_src>
import jax
import jax.numpy as jnp
from jax.experimental import pallas as pl
from jax.experimental.pallas import tpu as pltpu

_EPS = 1e-5      # PyTorch BatchNorm1d default
_LANE = 128      # TPU lane width


def _round_up(x, m):
    return (x + m - 1) // m * m


# ----------------------------- Pallas kernel -------------------------------
def _make_kernel(B, L, Cp_in, Cp_out, stride, has_downsample, mxu_dtype):
    Lout = (L + 2 - 3) // stride + 1  # conv1d(k=3, pad=1, stride)

    def _mm(lhs2d, w_ref):
        # (B*Lout, Ci) @ (Ci, Cp_out) single 2-D MXU matmul, f32 accumulation.
        r = jnp.dot(lhs2d.astype(mxu_dtype), w_ref[...].astype(mxu_dtype),
                    preferred_element_type=jnp.float32)
        return r.reshape(B, Lout, Cp_out)

    def _bn_train(h, g_ref, be_ref, relu):
        # Training-mode BN (biased variance over (N, L)), single pass:
        # E[x], E[x^2] -> folded scale/shift -> one FMA per element.
        n = h.shape[0] * h.shape[1]
        inv_n = 1.0 / n
        s1 = jnp.sum(h, axis=(0, 1), keepdims=True)
        s2 = jnp.sum(h * h, axis=(0, 1), keepdims=True)
        mean = s1 * inv_n
        var = s2 * inv_n - mean * mean
        scale = g_ref[...] * jax.lax.rsqrt(var + _EPS)     # rsqrt -> EUP slot
        shift = be_ref[...] - mean * scale
        y = h * scale + shift
        return jnp.maximum(y, 0.0) if relu else y

    def kernel(*refs):
        if has_downsample:
            (x_ref, w1_ref, g1_ref, be1_ref,
             w2_ref, g2_ref, be2_ref,
             wd_ref, gd_ref, bed_ref,
             out_ref, t1, t2) = refs
        else:
            (x_ref, w1_ref, g1_ref, be1_ref,
             w2_ref, g2_ref, be2_ref,
             out_ref, t1, t2) = refs

        x = x_ref[...]                                     # (B, L, Cp_in)

        # ---- conv1: write the 3 tap slabs of the im2col LHS directly into
        #      VMEM scratch t1 (no padded intermediate, no concatenate) ----
        # output j, tap k reads input index j*stride + k - 1 (pad = 1).
        for k in range(3):
            lo = 1 if k == 0 else 0                        # first valid output row
            hi = min(Lout - 1, (L - k) // stride)          # last valid output row
            cnt = hi - lo + 1
            start = lo * stride + k - 1                    # always >= 0
            c0, c1 = k * Cp_in, (k + 1) * Cp_in
            if lo > 0:                                     # rows reading left pad
                t1[:, 0:lo, c0:c1] = jnp.zeros((B, lo, Cp_in), jnp.float32)
            if hi + 1 < Lout:                              # rows reading right pad
                t1[:, hi + 1:Lout, c0:c1] = jnp.zeros((B, Lout - 1 - hi, Cp_in),
                                                      jnp.float32)
            t1[:, lo:hi + 1, c0:c1] = \
                x[:, start:start + (cnt - 1) * stride + 1:stride, :]

        # conv bias is skipped: a per-channel constant cancels exactly under
        # batch-statistics BN (h + b - mean(h + b) == h - mean(h)).
        h = _mm(t1[...].reshape(B * Lout, 3 * Cp_in), w1_ref)     # (B,Lout,Cpo)
        h = _bn_train(h, g1_ref, be1_ref, relu=True)

        # ---- conv2 (stride 1): im2col slabs built from h straight into t2 ----
        Cpo = Cp_out
        t2[:, :, Cpo:2 * Cpo] = h                                  # center tap
        t2[:, 0:1, 0:Cpo] = jnp.zeros((B, 1, Cpo), jnp.float32)
        t2[:, Lout - 1:Lout, 2 * Cpo:3 * Cpo] = jnp.zeros((B, 1, Cpo), jnp.float32)
        if Lout > 1:
            t2[:, 1:Lout, 0:Cpo] = h[:, 0:Lout - 1, :]             # left tap
            t2[:, 0:Lout - 1, 2 * Cpo:3 * Cpo] = h[:, 1:Lout, :]   # right tap

        h2 = _mm(t2[...].reshape(B * Lout, 3 * Cpo), w2_ref)       # (B,Lout,Cpo)
        h2 = _bn_train(h2, g2_ref, be2_ref, relu=False)

        # ---- identity / downsample branch ----
        if has_downsample:
            xs = x if stride == 1 else x[:, 0:(Lout - 1) * stride + 1:stride, :]
            idn = jnp.dot(xs.reshape(B * Lout, Cp_in).astype(mxu_dtype),
                          wd_ref[...].astype(mxu_dtype),
                          preferred_element_type=jnp.float32).reshape(B, Lout, Cp_out)
            idn = _bn_train(idn, gd_ref, bed_ref, relu=False)
        else:
            idn = x                                # stride==1, Cin==Cout here

        # lane-dense (Cp_out multiple of 128) unmasked store
        out_ref[...] = jnp.maximum(h2 + idn, 0.0).astype(out_ref.dtype)

    return kernel, Lout


# ------------------------------ wrapper -------------------------------------
def residual_block_1d(x_ncl, params, stride=1, mxu_dtype=jnp.float32):
    """x_ncl: (B, Cin, L) float32 in PyTorch NCL layout.

    mxu_dtype=jnp.bfloat16 is recommended on v6e/v7x (f32 accumulation is kept);
    default f32 so results match the f32 reference to 1e-4.
    """
    B, Cin, L = x_ncl.shape
    Cout = params['w1'].shape[0]
    has_ds = (stride != 1) or (Cin != Cout)
    Cp_in = _round_up(Cin, _LANE)
    Cp_out = _round_up(Cout, _LANE)

    # single layout pass: NCL -> NLC + zero-pad channels to lane width.
    x = jnp.transpose(x_ncl, (0, 2, 1))                       # (B, L, Cin)
    x = jnp.pad(x, ((0, 0), (0, 0), (0, Cp_in - Cin)))        # (B, L, Cp_in)

    def fuse_w3(w):   # (Cout, Cin, 3) -> (3*Cp_ci, Cp_out) fused tap block
        Co, Ci, K = w.shape
        Cpi = _round_up(Ci, _LANE)
        wt = jnp.transpose(w, (2, 1, 0))                      # (3, Ci, Co)
        wt = jnp.pad(wt, ((0, 0), (0, Cpi - Ci), (0, Cp_out - Co)))
        return wt.reshape(K * Cpi, Cp_out)

    def vec(v):       # (C,) -> (1, 1, Cp_out), zero-padded channels
        return jnp.pad(v, (0, Cp_out - v.shape[0])).reshape(1, 1, Cp_out)

    # Conv biases are intentionally not passed: they cancel under batch-stat BN.
    args = [x,
            fuse_w3(params['w1']), vec(params['g1']), vec(params['be1']),
            fuse_w3(params['w2']), vec(params['g2']), vec(params['be2'])]
    if has_ds:
        wd = jnp.transpose(params['wd'][:, :, 0], (1, 0))     # (Cin, Cout)
        wd = jnp.pad(wd, ((0, Cp_in - Cin), (0, Cp_out - Cout)))
        args += [wd, vec(params['gd']), vec(params['bed'])]

    kernel, Lout = _make_kernel(B, L, Cp_in, Cp_out, stride, has_ds, mxu_dtype)

    out_blc = pl.pallas_call(
        kernel,
        out_shape=jax.ShapeDtypeStruct((B, Lout, Cp_out), jnp.float32),
        in_specs=[pl.BlockSpec(memory_space=pltpu.MemorySpace.VMEM)] * len(args),
        out_specs=pl.BlockSpec(memory_space=pltpu.MemorySpace.VMEM),
        scratch_shapes=[pltpu.VMEM((B, Lout, 3 * Cp_in), jnp.float32),   # conv1 im2col
                        pltpu.VMEM((B, Lout, 3 * Cp_out), jnp.float32)], # conv2 im2col
    )(*args)
    # drop padded channels, back to PyTorch NCL layout
    return jnp.transpose(out_blc[:, :, :Cout], (0, 2, 1))     # (B, Cout, Lout)


# --------------------------- pure-JAX reference ------------------------------
def _bn_ref_ncl(h, gamma, beta):
    mean = jnp.mean(h, axis=(0, 2), keepdims=True)
    var = jnp.mean(jnp.square(h - mean), axis=(0, 2), keepdims=True)
    return (h - mean) / jnp.sqrt(var + _EPS) * gamma.reshape(1, -1, 1) + beta.reshape(1, -1, 1)


def reference(x, p, stride):
    def conv(inp, w, s, pad):
        dn = jax.lax.conv_dimension_numbers(inp.shape, w.shape, ('NCH', 'OIH', 'NCH'))
        return jax.lax.conv_general_dilated(inp, w, (s,), [pad], dimension_numbers=dn)

    h = conv(x, p['w1'], stride, (1, 1)) + p['b1'].reshape(1, -1, 1)
    h = jnp.maximum(_bn_ref_ncl(h, p['g1'], p['be1']), 0.0)
    h2 = conv(h, p['w2'], 1, (1, 1)) + p['b2'].reshape(1, -1, 1)
    h2 = _bn_ref_ncl(h2, p['g2'], p['be2'])
    if 'wd' in p:
        idn = conv(x, p['wd'], stride, (0, 0)) + p['bd'].reshape(1, -1, 1)
        idn = _bn_ref_ncl(idn, p['gd'], p['bed'])
    else:
        idn = x
    return jnp.maximum(h2 + idn, 0.0)


# ------------------------------ params init ---------------------------------
def init_params(key, in_channels, out_channels, stride):
    has_ds = (stride != 1) or (in_channels != out_channels)
    ks = jax.random.split(key, 12)
    p = {
        'w1': 0.1 * jax.random.normal(ks[0], (out_channels, in_channels, 3), jnp.float32),
        'b1': 0.1 * jax.random.normal(ks[1], (out_channels,), jnp.float32),
        'g1': 1.0 + 0.1 * jax.random.normal(ks[2], (out_channels,), jnp.float32),
        'be1': 0.1 * jax.random.normal(ks[3], (out_channels,), jnp.float32),
        'w2': 0.1 * jax.random.normal(ks[4], (out_channels, out_channels, 3), jnp.float32),
        'b2': 0.1 * jax.random.normal(ks[5], (out_channels,), jnp.float32),
        'g2': 1.0 + 0.1 * jax.random.normal(ks[6], (out_channels,), jnp.float32),
        'be2': 0.1 * jax.random.normal(ks[7], (out_channels,), jnp.float32),
    }
    if has_ds:
        p['wd'] = 0.1 * jax.random.normal(ks[8], (out_channels, in_channels, 1), jnp.float32)
        p['bd'] = 0.1 * jax.random.normal(ks[9], (out_channels,), jnp.float32)
        p['gd'] = 1.0 + 0.1 * jax.random.normal(ks[10], (out_channels,), jnp.float32)
        p['bed'] = 0.1 * jax.random.normal(ks[11], (out_channels,), jnp.float32)
    return p


# --------------------------------- main --------------------------------------
if __name__ == "__main__":
    key = jax.random.PRNGKey(0)

    # case 1: Cin != Cout -> downsample branch active (stride=1)
    B, Cin, Cout, L, stride = 2, 4, 8, 16, 1
    kx, kp, key = jax.random.split(key, 3)
    x = jax.random.normal(kx, (B, Cin, L), jnp.float32)
    params = init_params(kp, Cin, Cout, stride)
    out = jax.block_until_ready(residual_block_1d(x, params, stride=stride))
    ref = reference(x, params, stride)
    assert out.shape == ref.shape, (out.shape, ref.shape)
    assert jnp.allclose(out, ref, rtol=1e-4, atol=1e-4), float(jnp.max(jnp.abs(out - ref)))

    # case 2: Cin == Cout, stride=1 -> pure identity branch
    B2, C2, L2, s2 = 2, 8, 16, 1
    kx2, kp2, key = jax.random.split(key, 3)
    x2 = jax.random.normal(kx2, (B2, C2, L2), jnp.float32)
    params2 = init_params(kp2, C2, C2, s2)
    out2 = jax.block_until_ready(residual_block_1d(x2, params2, stride=s2))
    ref2 = reference(x2, params2, s2)
    assert out2.shape == ref2.shape, (out2.shape, ref2.shape)
    assert jnp.allclose(out2, ref2, rtol=1e-4, atol=1e-4), float(jnp.max(jnp.abs(out2 - ref2)))

    # case 3: stride=2 -> strided conv1 + 1x1 strided downsample
    B3, Cin3, Cout3, L3, s3 = 2, 4, 8, 16, 2
    kx3, kp3, key = jax.random.split(key, 3)
    x3 = jax.random.normal(kx3, (B3, Cin3, L3), jnp.float32)
    params3 = init_params(kp3, Cin3, Cout3, s3)
    out3 = jax.block_until_ready(residual_block_1d(x3, params3, stride=s3))
    ref3 = reference(x3, params3, s3)
    assert out3.shape == ref3.shape, (out3.shape, ref3.shape)
    assert jnp.allclose(out3, ref3, rtol=1e-4, atol=1e-4), float(jnp.max(jnp.abs(out3 - ref3)))

    print("KERNEL_OK")
</pallas_src>

<mosaic_0001>
module attributes {stable_mosaic.version = 11 : i64} {
  func.func @kernel(%arg0: memref<2x16x128xf32, #tpu.memory_space<vmem>>, %arg1: memref<384x128xf32, #tpu.memory_space<vmem>>, %arg2: memref<1x1x128xf32, #tpu.memory_space<vmem>>, %arg3: memref<1x1x128xf32, #tpu.memory_space<vmem>>, %arg4: memref<384x128xf32, #tpu.memory_space<vmem>>, %arg5: memref<1x1x128xf32, #tpu.memory_space<vmem>>, %arg6: memref<1x1x128xf32, #tpu.memory_space<vmem>>, %arg7: memref<128x128xf32, #tpu.memory_space<vmem>>, %arg8: memref<1x1x128xf32, #tpu.memory_space<vmem>>, %arg9: memref<1x1x128xf32, #tpu.memory_space<vmem>>, %arg10: memref<2x16x128xf32, #tpu.memory_space<vmem>>, %arg11: memref<2x16x384xf32, #tpu.memory_space<vmem>>, %arg12: memref<2x16x384xf32, #tpu.memory_space<vmem>>) attributes {dimension_semantics = [], scalar_prefetch = 0 : i64, scratch_operands = 2 : i64, tpu.core_type = #tpu.core_type<tc>} {
    %c0 = arith.constant 0 : index
    %c0_0 = arith.constant 0 : index
    %c0_1 = arith.constant 0 : index
    %0 = vector.load %arg0[%c0, %c0_0, %c0_1] : memref<2x16x128xf32, #tpu.memory_space<vmem>>, vector<2x16x128xf32>
    %cst = arith.constant 0.000000e+00 : f32
    %1 = vector.broadcast %cst : f32 to vector<2x1x128xf32>
    %c0_2 = arith.constant 0 : index
    %c0_3 = arith.constant 0 : index
    %c0_4 = arith.constant 0 : index
    %2 = vector.load %arg11[%c0_2, %c0_3, %c0_4] : memref<2x16x384xf32, #tpu.memory_space<vmem>>, vector<2x1x128xf32>
    tpu.vector_store %arg11[%c0_2, %c0_3, %c0_4], %1 {strides = array<i32>} : memref<2x16x384xf32, #tpu.memory_space<vmem>>, vector<2x1x128xf32>,
    %3 = vector.extract_strided_slice %0 {offsets = [0, 0, 0], sizes = [2, 15, 128], strides = [1, 1, 1]} : vector<2x16x128xf32> to vector<2x15x128xf32>
    %c0_5 = arith.constant 0 : index
    %c1 = arith.constant 1 : index
    %c0_6 = arith.constant 0 : index
    %4 = vector.load %arg11[%c0_5, %c1, %c0_6] : memref<2x16x384xf32, #tpu.memory_space<vmem>>, vector<2x15x128xf32>
    tpu.vector_store %arg11[%c0_5, %c1, %c0_6], %3 {strides = array<i32>} : memref<2x16x384xf32, #tpu.memory_space<vmem>>, vector<2x15x128xf32>,
    %c0_7 = arith.constant 0 : index
    %c0_8 = arith.constant 0 : index
    %c128 = arith.constant 128 : index
    %5 = vector.load %arg11[%c0_7, %c0_8, %c128] : memref<2x16x384xf32, #tpu.memory_space<vmem>>, vector<2x16x128xf32>
    tpu.vector_store %arg11[%c0_7, %c0_8, %c128], %0 {strides = array<i32>} : memref<2x16x384xf32, #tpu.memory_space<vmem>>, vector<2x16x128xf32>,
    %cst_9 = arith.constant 0.000000e+00 : f32
    %6 = vector.broadcast %cst_9 : f32 to vector<2x1x128xf32>
    %c0_10 = arith.constant 0 : index
    %c15 = arith.constant 15 : index
    %c256 = arith.constant 256 : index
    %7 = vector.load %arg11[%c0_10, %c15, %c256] : memref<2x16x384xf32, #tpu.memory_space<vmem>>, vector<2x1x128xf32>
    tpu.vector_store %arg11[%c0_10, %c15, %c256], %6 {strides = array<i32>} : memref<2x16x384xf32, #tpu.memory_space<vmem>>, vector<2x1x128xf32>,
    %8 = vector.extract_strided_slice %0 {offsets = [0, 1, 0], sizes = [2, 15, 128], strides = [1, 1, 1]} : vector<2x16x128xf32> to vector<2x15x128xf32>
    %c0_11 = arith.constant 0 : index
    %c0_12 = arith.constant 0 : index
    %c256_13 = arith.constant 256 : index
    %9 = vector.load %arg11[%c0_11, %c0_12, %c256_13] : memref<2x16x384xf32, #tpu.memory_space<vmem>>, vector<2x15x128xf32>
    tpu.vector_store %arg11[%c0_11, %c0_12, %c256_13], %8 {strides = array<i32>} : memref<2x16x384xf32, #tpu.memory_space<vmem>>, vector<2x15x128xf32>,
    %c0_14 = arith.constant 0 : index
    %c0_15 = arith.constant 0 : index
    %c0_16 = arith.constant 0 : index
    %10 = vector.load %arg11[%c0_14, %c0_15, %c0_16] : memref<2x16x384xf32, #tpu.memory_space<vmem>>, vector<2x16x384xf32>
    %11 = vector.shape_cast %10 : vector<2x16x384xf32> to vector<32x384xf32>
    %c0_17 = arith.constant 0 : index
    %c0_18 = arith.constant 0 : index
    %12 = vector.load %arg1[%c0_17, %c0_18] : memref<384x128xf32, #tpu.memory_space<vmem>>, vector<384x128xf32>
    %cst_19 = arith.constant dense<0.000000e+00> : vector<32x128xf32>
    %13 = tpu.matmul %11, %12, %cst_19 {dimension_numbers = #tpu.dot_dimension_numbers<[1], [0], [0], [1], [0, 0, 1, 1], [], []>} : vector<32x384xf32>, vector<384x128xf32>, vector<32x128xf32> -> vector<32x128xf32>
    %14 = vector.shape_cast %13 : vector<32x128xf32> to vector<2x16x128xf32>
    %cst_20 = arith.constant dense<0.000000e+00> : vector<128xf32>
    %15 = vector.multi_reduction <add>, %14, %cst_20 [0, 1] : vector<2x16x128xf32> to vector<128xf32>
    %16 = vector.shape_cast %15 : vector<128xf32> to vector<1x1x128xf32>
    %17 = arith.mulf %14, %14 : vector<2x16x128xf32>
    %cst_21 = arith.constant dense<0.000000e+00> : vector<128xf32>
    %18 = vector.multi_reduction <add>, %17, %cst_21 [0, 1] : vector<2x16x128xf32> to vector<128xf32>
    %19 = vector.shape_cast %18 : vector<128xf32> to vector<1x1x128xf32>
    %cst_22 = arith.constant 3.125000e-02 : f32
    %20 = vector.broadcast %cst_22 : f32 to vector<1x1x128xf32>
    %21 = arith.mulf %16, %20 : vector<1x1x128xf32>
    %cst_23 = arith.constant 3.125000e-02 : f32
    %22 = vector.broadcast %cst_23 : f32 to vector<1x1x128xf32>
    %23 = arith.mulf %19, %22 : vector<1x1x128xf32>
    %24 = arith.mulf %21, %21 : vector<1x1x128xf32>
    %25 = arith.subf %23, %24 : vector<1x1x128xf32>
    %c0_24 = arith.constant 0 : index
    %c0_25 = arith.constant 0 : index
    %c0_26 = arith.constant 0 : index
    %26 = vector.load %arg2[%c0_24, %c0_25, %c0_26] : memref<1x1x128xf32, #tpu.memory_space<vmem>>, vector<1x1x128xf32>
    %cst_27 = arith.constant 9.99999974E-6 : f32
    %27 = vector.broadcast %cst_27 : f32 to vector<1x1x128xf32>
    %28 = arith.addf %25, %27 : vector<1x1x128xf32>
    %29 = math.rsqrt %28 : vector<1x1x128xf32>
    %30 = arith.mulf %26, %29 : vector<1x1x128xf32>
    %c0_28 = arith.constant 0 : index
    %c0_29 = arith.constant 0 : index
    %c0_30 = arith.constant 0 : index
    %31 = vector.load %arg3[%c0_28, %c0_29, %c0_30] : memref<1x1x128xf32, #tpu.memory_space<vmem>>, vector<1x1x128xf32>
    %32 = arith.mulf %21, %30 : vector<1x1x128xf32>
    %33 = arith.subf %31, %32 : vector<1x1x128xf32>
    %34 = vector.broadcast %30 : vector<1x1x128xf32> to vector<2x16x128xf32>
    %35 = arith.mulf %14, %34 : vector<2x16x128xf32>
    %36 = vector.broadcast %33 : vector<1x1x128xf32> to vector<2x16x128xf32>
    %37 = arith.addf %35, %36 : vector<2x16x128xf32>
    %cst_31 = arith.constant 0.000000e+00 : f32
    %38 = vector.broadcast %cst_31 : f32 to vector<2x16x128xf32>
    %39 = arith.maximumf %37, %38 : vector<2x16x128xf32>
    %c0_32 = arith.constant 0 : index
    %c0_33 = arith.constant 0 : index
    %c128_34 = arith.constant 128 : index
    %40 = vector.load %arg12[%c0_32, %c0_33, %c128_34] : memref<2x16x384xf32, #tpu.memory_space<vmem>>, vector<2x16x128xf32>
    tpu.vector_store %arg12[%c0_32, %c0_33, %c128_34], %39 {strides = array<i32>} : memref<2x16x384xf32, #tpu.memory_space<vmem>>, vector<2x16x128xf32>,
    %cst_35 = arith.constant 0.000000e+00 : f32
    %41 = vector.broadcast %cst_35 : f32 to vector<2x1x128xf32>
    %c0_36 = arith.constant 0 : index
    %c0_37 = arith.constant 0 : index
    %c0_38 = arith.constant 0 : index
    %42 = vector.load %arg12[%c0_36, %c0_37, %c0_38] : memref<2x16x384xf32, #tpu.memory_space<vmem>>, vector<2x1x128xf32>
    tpu.vector_store %arg12[%c0_36, %c0_37, %c0_38], %41 {strides = array<i32>} : memref<2x16x384xf32, #tpu.memory_space<vmem>>, vector<2x1x128xf32>,
    %cst_39 = arith.constant 0.000000e+00 : f32
    %43 = vector.broadcast %cst_39 : f32 to vector<2x1x128xf32>
    %c0_40 = arith.constant 0 : index
    %c15_41 = arith.constant 15 : index
    %c256_42 = arith.constant 256 : index
    %44 = vector.load %arg12[%c0_40, %c15_41, %c256_42] : memref<2x16x384xf32, #tpu.memory_space<vmem>>, vector<2x1x128xf32>
    tpu.vector_store %arg12[%c0_40, %c15_41, %c256_42], %43 {strides = array<i32>} : memref<2x16x384xf32, #tpu.memory_space<vmem>>, vector<2x1x128xf32>,
    %45 = vector.extract_strided_slice %39 {offsets = [0, 0, 0], sizes = [2, 15, 128], strides = [1, 1, 1]} : vector<2x16x128xf32> to vector<2x15x128xf32>
    %c0_43 = arith.constant 0 : index
    %c1_44 = arith.constant 1 : index
    %c0_45 = arith.constant 0 : index
    %46 = vector.load %arg12[%c0_43, %c1_44, %c0_45] : memref<2x16x384xf32, #tpu.memory_space<vmem>>, vector<2x15x128xf32>
    tpu.vector_store %arg12[%c0_43, %c1_44, %c0_45], %45 {strides = array<i32>} : memref<2x16x384xf32, #tpu.memory_space<vmem>>, vector<2x15x128xf32>,
    %47 = vector.extract_strided_slice %39 {offsets = [0, 1, 0], sizes = [2, 15, 128], strides = [1, 1, 1]} : vector<2x16x128xf32> to vector<2x15x128xf32>
    %c0_46 = arith.constant 0 : index
    %c0_47 = arith.constant 0 : index
    %c256_48 = arith.constant 256 : index
    %48 = vector.load %arg12[%c0_46, %c0_47, %c256_48] : memref<2x16x384xf32, #tpu.memory_space<vmem>>, vector<2x15x128xf32>
    tpu.vector_store %arg12[%c0_46, %c0_47, %c256_48], %47 {strides = array<i32>} : memref<2x16x384xf32, #tpu.memory_space<vmem>>, vector<2x15x128xf32>,
    %c0_49 = arith.constant 0 : index
    %c0_50 = arith.constant 0 : index
    %c0_51 = arith.constant 0 : index
    %49 = vector.load %arg12[%c0_49, %c0_50, %c0_51] : memref<2x16x384xf32, #tpu.memory_space<vmem>>, vector<2x16x384xf32>
    %50 = vector.shape_cast %49 : vector<2x16x384xf32> to vector<32x384xf32>
    %c0_52 = arith.constant 0 : index
    %c0_53 = arith.constant 0 : index
    %51 = vector.load %arg4[%c0_52, %c0_53] : memref<384x128xf32, #tpu.memory_space<vmem>>, vector<384x128xf32>
    %cst_54 = arith.constant dense<0.000000e+00> : vector<32x128xf32>
    %52 = tpu.matmul %50, %51, %cst_54 {dimension_numbers = #tpu.dot_dimension_numbers<[1], [0], [0], [1], [0, 0, 1, 1], [], []>} : vector<32x384xf32>, vector<384x128xf32>, vector<32x128xf32> -> vector<32x128xf32>
    %53 = vector.shape_cast %52 : vector<32x128xf32> to vector<2x16x128xf32>
    %cst_55 = arith.constant dense<0.000000e+00> : vector<128xf32>
    %54 = vector.multi_reduction <add>, %53, %cst_55 [0, 1] : vector<2x16x128xf32> to vector<128xf32>
    %55 = vector.shape_cast %54 : vector<128xf32> to vector<1x1x128xf32>
    %56 = arith.mulf %53, %53 : vector<2x16x128xf32>
    %cst_56 = arith.constant dense<0.000000e+00> : vector<128xf32>
    %57 = vector.multi_reduction <add>, %56, %cst_56 [0, 1] : vector<2x16x128xf32> to vector<128xf32>
    %58 = vector.shape_cast %57 : vector<128xf32> to vector<1x1x128xf32>
    %cst_57 = arith.constant 3.125000e-02 : f32
    %59 = vector.broadcast %cst_57 : f32 to vector<1x1x128xf32>
    %60 = arith.mulf %55, %59 : vector<1x1x128xf32>
    %cst_58 = arith.constant 3.125000e-02 : f32
    %61 = vector.broadcast %cst_58 : f32 to vector<1x1x128xf32>
    %62 = arith.mulf %58, %61 : vector<1x1x128xf32>
    %63 = arith.mulf %60, %60 : vector<1x1x128xf32>
    %64 = arith.subf %62, %63 : vector<1x1x128xf32>
    %c0_59 = arith.constant 0 : index
    %c0_60 = arith.constant 0 : index
    %c0_61 = arith.constant 0 : index
    %65 = vector.load %arg5[%c0_59, %c0_60, %c0_61] : memref<1x1x128xf32, #tpu.memory_space<vmem>>, vector<1x1x128xf32>
    %cst_62 = arith.constant 9.99999974E-6 : f32
    %66 = vector.broadcast %cst_62 : f32 to vector<1x1x128xf32>
    %67 = arith.addf %64, %66 : vector<1x1x128xf32>
    %68 = math.rsqrt %67 : vector<1x1x128xf32>
    %69 = arith.mulf %65, %68 : vector<1x1x128xf32>
    %c0_63 = arith.constant 0 : index
    %c0_64 = arith.constant 0 : index
    %c0_65 = arith.constant 0 : index
    %70 = vector.load %arg6[%c0_63, %c0_64, %c0_65] : memref<1x1x128xf32, #tpu.memory_space<vmem>>, vector<1x1x128xf32>
    %71 = arith.mulf %60, %69 : vector<1x1x128xf32>
    %72 = arith.subf %70, %71 : vector<1x1x128xf32>
    %73 = vector.broadcast %69 : vector<1x1x128xf32> to vector<2x16x128xf32>
    %74 = arith.mulf %53, %73 : vector<2x16x128xf32>
    %75 = vector.broadcast %72 : vector<1x1x128xf32> to vector<2x16x128xf32>
    %76 = arith.addf %74, %75 : vector<2x16x128xf32>
    %77 = vector.shape_cast %0 : vector<2x16x128xf32> to vector<32x128xf32>
    %c0_66 = arith.constant 0 : index
    %c0_67 = arith.constant 0 : index
    %78 = vector.load %arg7[%c0_66, %c0_67] : memref<128x128xf32, #tpu.memory_space<vmem>>, vector<128x128xf32>
    %cst_68 = arith.constant dense<0.000000e+00> : vector<32x128xf32>
    %79 = tpu.matmul %77, %78, %cst_68 {dimension_numbers = #tpu.dot_dimension_numbers<[1], [0], [0], [1], [0, 0, 1, 1], [], []>} : vector<32x128xf32>, vector<128x128xf32>, vector<32x128xf32> -> vector<32x128xf32>
    %80 = vector.shape_cast %79 : vector<32x128xf32> to vector<2x16x128xf32>
    %cst_69 = arith.constant dense<0.000000e+00> : vector<128xf32>
    %81 = vector.multi_reduction <add>, %80, %cst_69 [0, 1] : vector<2x16x128xf32> to vector<128xf32>
    %82 = vector.shape_cast %81 : vector<128xf32> to vector<1x1x128xf32>
    %83 = arith.mulf %80, %80 : vector<2x16x128xf32>
    %cst_70 = arith.constant dense<0.000000e+00> : vector<128xf32>
    %84 = vector.multi_reduction <add>, %83, %cst_70 [0, 1] : vector<2x16x128xf32> to vector<128xf32>
    %85 = vector.shape_cast %84 : vector<128xf32> to vector<1x1x128xf32>
    %cst_71 = arith.constant 3.125000e-02 : f32
    %86 = vector.broadcast %cst_71 : f32 to vector<1x1x128xf32>
    %87 = arith.mulf %82, %86 : vector<1x1x128xf32>
    %cst_72 = arith.constant 3.125000e-02 : f32
    %88 = vector.broadcast %cst_72 : f32 to vector<1x1x128xf32>
    %89 = arith.mulf %85, %88 : vector<1x1x128xf32>
    %90 = arith.mulf %87, %87 : vector<1x1x128xf32>
    %91 = arith.subf %89, %90 : vector<1x1x128xf32>
    %c0_73 = arith.constant 0 : index
    %c0_74 = arith.constant 0 : index
    %c0_75 = arith.constant 0 : index
    %92 = vector.load %arg8[%c0_73, %c0_74, %c0_75] : memref<1x1x128xf32, #tpu.memory_space<vmem>>, vector<1x1x128xf32>
    %cst_76 = arith.constant 9.99999974E-6 : f32
    %93 = vector.broadcast %cst_76 : f32 to vector<1x1x128xf32>
    %94 = arith.addf %91, %93 : vector<1x1x128xf32>
    %95 = math.rsqrt %94 : vector<1x1x128xf32>
    %96 = arith.mulf %92, %95 : vector<1x1x128xf32>
    %c0_77 = arith.constant 0 : index
    %c0_78 = arith.constant 0 : index
    %c0_79 = arith.constant 0 : index
    %97 = vector.load %arg9[%c0_77, %c0_78, %c0_79] : memref<1x1x128xf32, #tpu.memory_space<vmem>>, vector<1x1x128xf32>
    %98 = arith.mulf %87, %96 : vector<1x1x128xf32>
    %99 = arith.subf %97, %98 : vector<1x1x128xf32>
    %100 = vector.broadcast %96 : vector<1x1x128xf32> to vector<2x16x128xf32>
    %101 = arith.mulf %80, %100 : vector<2x16x128xf32>
    %102 = vector.broadcast %99 : vector<1x1x128xf32> to vector<2x16x128xf32>
    %103 = arith.addf %101, %102 : vector<2x16x128xf32>
    %104 = arith.addf %76, %103 : vector<2x16x128xf32>
    %cst_80 = arith.constant 0.000000e+00 : f32
    %105 = vector.broadcast %cst_80 : f32 to vector<2x16x128xf32>
    %106 = arith.maximumf %104, %105 : vector<2x16x128xf32>
    %c0_81 = arith.constant 0 : index
    %c0_82 = arith.constant 0 : index
    %c0_83 = arith.constant 0 : index
    %107 = vector.load %arg10[%c0_81, %c0_82, %c0_83] : memref<2x16x128xf32, #tpu.memory_space<vmem>>, vector<2x16x128xf32>
    tpu.vector_store %arg10[%c0_81, %c0_82, %c0_83], %106 {strides = array<i32>} : memref<2x16x128xf32, #tpu.memory_space<vmem>>, vector<2x16x128xf32>,
    return
  }
}

</mosaic_0001>

<bundles_post_ra>
// kernel: tpu_custom_call.1
= control target key start
LH: loop header
LB: loop body
LE: loop exit
PB: predicated region body
PF: predicated region fallthrough
CT: control target
= control target key end

     0   :  { %15 = vsyncpa [#allocation5], 0  ;;  %s1736_s0 = inlined_call_operand.hbm [shape: f32[2,16,128], index: 0, kind: input, shape index: {}]   ;;  %s1737_s1 = inlined_call_operand.hbm [shape: f32[384,128], index: 1, kind: input, shape index: {}]   ;;  %s1738_s2 = inlined_call_operand.vmem [shape: f32[1,1,128], index: 2, kind: input, shape index: {}]   ;;  %s1739_s3 = inlined_call_operand.vmem [shape: f32[1,1,128], index: 3, kind: input, shape index: {}]   ;;  %s1740_s4 = inlined_call_operand.hbm [shape: f32[384,128], index: 4, kind: input, shape index: {}]   ;;  %s1741_s5 = inlined_call_operand.vmem [shape: f32[1,1,128], index: 5, kind: input, shape index: {}]   ;;  %s1742_s6 = inlined_call_operand.vmem [shape: f32[1,1,128], index: 6, kind: input, shape index: {}]   ;;  %s1743_s7 = inlined_call_operand.hbm [shape: f32[128,128], index: 7, kind: input, shape index: {}]   ;;  %s1744_s8 = inlined_call_operand.vmem [shape: f32[1,1,128], index: 8, kind: input, shape index: {}]   ;;  %s1745_s9 = inlined_call_operand.vmem [shape: f32[1,1,128], index: 9, kind: input, shape index: {}]   ;;  %s1746_s10 = inlined_call_operand.hbm [shape: f32[2,16,128], index: 10, kind: output, shape index: {}]  }
   0x1   :  { %16 = vsyncpa [#allocation8], 0 }
   0x2   :  { %17 = vsyncpa [#allocation11], 0 }
   0x3   :  { %18 = vsyncpa [#allocation6], 0  ;;  %s1502_s13 = smov [#allocation7]   ;;  %s1503_s15 = smov [#allocation4]  }
   0x4   :  { %s36_s14 = sshll.u32 %s1502_s13, 4  ;;  %s24_s16 = sshll.u32 %s1503_s15, 4  ;;  %s37_s14 = int_to_ptr.vmem [resolvable:$true] %s36_s14  ;;  %s1565_s16 = int_to_ptr.vmem [resolvable:$true] %s24_s16 }
   0x5   :  { %s1384_s19 = scalar_lea.hbm %s1737_s1, 6144 }
   0x6   :  { %p1385_p0 = scmp.ne.s32.totalorder %s1737_s1, %s1384_s19  ;;  %p1388_p1 = scmp.lt.u32.totalorder %s1384_s19, %s1737_s1 }
   0x8   :  { %p1390_p2 = pnand %p1388_p1, %p1385_p0 }
   0xa   :  { %1393 = shalt.err (!%p1390_p2)
}
   0xb   :  { %s1394_s24 = scalar_lea.vmem %s37_s14, 6144  ;;  %p1399_p4 = scmp.lt.s32.totalorder %s37_s14, %s37_s14 }
   0xc   :  { %p1395_p3 = scmp.ne.s32.totalorder %s37_s14, %s1394_s24  ;;  %p1400_p5 = scmp.lt.s32.totalorder %s1394_s24, %s1394_s24 }
   0xe   :  { %p1401_p6 = por %p1400_p5, %p1399_p4 }
  0x10   :  { %p1402_p7 = pnand %p1401_p6, %p1395_p3 }
  0x12   :  { %1405 = shalt.err (!%p1402_p7)
}
  0x13   :  { %s1504_s25 = smov 128   ;;  %s1505_s26 = smov 8  }
  0x14   :  { %42 = dma.hbm_to_vmem [thread:$0]  %s1737_s1, 6144, %s37_s14, [#allocation8], %s1504_s25, %s1504_s25, %s1505_s26  }
  0x15   :  { %s1406_s11 = scalar_lea.hbm %s1736_s0, 512 }
  0x16   :  { %p1407_p8 = scmp.ne.s32.totalorder %s1736_s0, %s1406_s11  ;;  %p1410_p9 = scmp.lt.u32.totalorder %s1406_s11, %s1736_s0 }
  0x18   :  { %p1412_p10 = pnand %p1410_p9, %p1407_p8 }
  0x1a   :  { %1415 = shalt.err (!%p1412_p10)
}
  0x1b   :  { %s1416_s18 = scalar_lea.vmem %s1565_s16, 512  ;;  %p1421_p12 = scmp.lt.s32.totalorder %s1565_s16, %s1565_s16 }
  0x1c   :  { %p1417_p11 = scmp.ne.s32.totalorder %s1565_s16, %s1416_s18  ;;  %p1422_p13 = scmp.lt.s32.totalorder %s1416_s18, %s1416_s18 }
  0x1e   :  { %p1423_p0 = por %p1422_p13, %p1421_p12 }
  0x20   :  { %p1424_p1 = pnand %p1423_p0, %p1417_p11 }
  0x22   :  { %1427 = shalt.err (!%p1424_p1)
}
  0x23   :  { %30 = dma.hbm_to_vmem [thread:$0]  %s1736_s0, 512, %s1565_s16, [#allocation5], %s1504_s25, %s1504_s25, %s1505_s26  }
  0x24   :  { %s1506_s19 = smov [#allocation9]   ;;  %s1507_s21 = smov [#allocation10]  }
  0x25   :  { %s52_s20 = sshll.u32 %s1506_s19, 4  ;;  %s68_s22 = sshll.u32 %s1507_s21, 4  ;;  %s53_s20 = int_to_ptr.vmem [resolvable:$true] %s52_s20  ;;  %s1602_s22 = int_to_ptr.vmem [resolvable:$true] %s68_s22 }
  0x26   :  { %s1428_s27 = scalar_lea.hbm %s1740_s4, 6144 }
  0x27   :  { %p1429_p2 = scmp.ne.s32.totalorder %s1740_s4, %s1428_s27  ;;  %p1432_p3 = scmp.lt.u32.totalorder %s1428_s27, %s1740_s4 }
  0x29   :  { %p1434_p4 = pnand %p1432_p3, %p1429_p2 }
  0x2b   :  { %1437 = shalt.err (!%p1434_p4)
}
  0x2c   :  { %s1438_s0 = scalar_lea.vmem %s53_s20, 6144  ;;  %p1443_p6 = scmp.lt.s32.totalorder %s53_s20, %s53_s20 }
  0x2d   :  { %p1439_p5 = scmp.ne.s32.totalorder %s53_s20, %s1438_s0  ;;  %p1444_p7 = scmp.lt.s32.totalorder %s1438_s0, %s1438_s0 }
  0x2f   :  { %p1445_p8 = por %p1444_p7, %p1443_p6 }
  0x31   :  { %p1446_p9 = pnand %p1445_p8, %p1439_p5 }
  0x33   :  { %1449 = shalt.err (!%p1446_p9)
}
  0x34   :  { %58 = dma.hbm_to_vmem [thread:$0]  %s1740_s4, 6144, %s53_s20, [#allocation8], %s1504_s25, %s1504_s25, %s1505_s26  }
  0x35   :  { %s1450_s17 = scalar_lea.hbm %s1743_s7, 2048 }
  0x36   :  { %p1451_p10 = scmp.ne.s32.totalorder %s1743_s7, %s1450_s17  ;;  %p1454_p11 = scmp.lt.u32.totalorder %s1450_s17, %s1743_s7 }
  0x38   :  { %p1456_p12 = pnand %p1454_p11, %p1451_p10 }
  0x3a   :  { %1459 = shalt.err (!%p1456_p12)
}
  0x3b   :  { %s1460_s21 = scalar_lea.vmem %s1602_s22, 2048  ;;  %p1465_p0 = scmp.lt.s32.totalorder %s1602_s22, %s1602_s22 }
  0x3c   :  { %p1461_p13 = scmp.ne.s32.totalorder %s1602_s22, %s1460_s21  ;;  %p1466_p1 = scmp.lt.s32.totalorder %s1460_s21, %s1460_s21 }
  0x3e   :  { %p1467_p2 = por %p1466_p1, %p1465_p0 }
  0x40   :  { %p1468_p3 = pnand %p1467_p2, %p1461_p13 }
  0x42   :  { %1471 = shalt.err (!%p1468_p3)
}
  0x43   :  { %74 = dma.hbm_to_vmem [thread:$0]  %s1743_s7, 2048, %s1602_s22, [#allocation11], %s1504_s25, %s1504_s25, %s1505_s26  }
  0x44   :  { %1494 = dma.done.wait [#allocation5], 512  }
  0x45   :  { %1495 = vsyncadd [#allocation5], 4294966784 }
  0x46   :  { %1496 = dma.done.wait [#allocation8], 12288  }
  0x47   :  { %1497 = vsyncadd [#allocation8], 4294955008 }
  0x48   :  { %1498 = dma.done.wait [#allocation11], 2048  }
  0x49   :  { %1499 = vsyncadd [#allocation11], 4294965248  ;;  %v1508_v0 = vmov 0.0   ;;  %v165_v1 = vld [vmem:[#allocation7 + $0x80] sm:$0xff]  ;;  %v166_v2 = vld [vmem:[#allocation7 + $0x88] sm:$0xff]  ;;  %vm122_vm0 = vcmask 1046528  }
  0x4a   :  { %95 = vst [vmem:[#allocation2] sm:$0x1] %v1508_v0  ;;  %96 = vst [vmem:[#allocation2 + $0x30] sm:$0x1] %v1508_v0  ;;  %v149_v3 = vld [vmem:[#allocation7] sm:$0xff]  ;;  %v1194_v4 = vpack.c.bf16 %v166_v2, %v165_v1  ;;  %v150_v5 = vld [vmem:[#allocation7 + $0x8] sm:$0xff] }
  0x4b   :  { %120 = vst [vmem:[#allocation2 + $0x2f] sm:$0x1] %v1508_v0  ;;  %121 = vst [vmem:[#allocation2 + $0x5f] sm:$0x1] %v1508_v0  ;;  %v181_v6 = vld [vmem:[#allocation7 + $0x100] sm:$0xff]  ;;  %v182_v7 = vld [vmem:[#allocation7 + $0x108] sm:$0xff]  ;;  %v1196_v8 = vpack.c.bf16 %v150_v5, %v149_v3 }
  0x4c   :  { %428 = vst [vmem:[#allocation3] sm:$0x1] %v1508_v0  ;;  %429 = vst [vmem:[#allocation3 + $0x30] sm:$0x1] %v1508_v0  ;;  %v1226_v9 = vpack.c.bf16 %v182_v7, %v181_v6  ;;  %v167_v10 = vld [vmem:[#allocation7 + $0x90] sm:$0xff]  ;;  %v168_v11 = vld [vmem:[#allocation7 + $0x98] sm:$0xff]  ;;  %1195 = vmatprep.subr.bf16.mxu0 %v1194_v4 }
  0x4d   :  { %430 = vst [vmem:[#allocation3 + $0x2f] sm:$0x1] %v1508_v0  ;;  %431 = vst [vmem:[#allocation3 + $0x5f] sm:$0x1] %v1508_v0  ;;  %v151_v12 = vld [vmem:[#allocation7 + $0x10] sm:$0xff]  ;;  %v1198_v13 = vpack.c.bf16 %v168_v11, %v167_v10  ;;  %v152_v14 = vld [vmem:[#allocation7 + $0x18] sm:$0xff]  ;;  %1197 = vmatpush3.bf16.msra.mxu0 %v1196_v8 }
  0x4e   :  { %v183_v15 = vld [vmem:[#allocation7 + $0x110] sm:$0xff]  ;;  %v184_v16 = vld [vmem:[#allocation7 + $0x118] sm:$0xff]  ;;  %1227 = vmatprep.subr.bf16.mxu1 %v1226_v9  ;;  %v1200_v17 = vpack.c.bf16 %v152_v14, %v151_v12  ;;  %v169_v19 = vld [vmem:[#allocation7 + $0xa0] sm:$0xff]  ;;  %vm101_vm1 = vcmask 1040384  }
  0x4f   :  { %v1230_v18 = vpack.c.bf16 %v184_v16, %v183_v15  ;;  %v170_v20 = vld [vmem:[#allocation7 + $0xa8] sm:$0xff]  ;;  %v153_v21 = vld [vmem:[#allocation7 + $0x20] sm:$0xff]  ;;  %1229 = vmatpush3.bf16.msra.mxu1 %v1226_v9  ;;  %1199 = vmatprep.subr.bf16.mxu0 %v1198_v13  ;;  %v171_v27 = vld [vmem:[#allocation7 + $0xb0] sm:$0xff] }
  0x50   :  { %v1202_v22 = vpack.c.bf16 %v170_v20, %v169_v19  ;;  %v154_v23 = vld [vmem:[#allocation7 + $0x28] sm:$0xff]  ;;  %v185_v24 = vld [vmem:[#allocation7 + $0x120] sm:$0xff]  ;;  %v172_v28 = vld [vmem:[#allocation7 + $0xb8] sm:$0xff] }
  0x51   :  { %v186_v25 = vld [vmem:[#allocation7 + $0x128] sm:$0xff]  ;;  %1231 = vmatprep.subr.bf16.mxu1 %v1230_v18  ;;  %v187_v29 = vld [vmem:[#allocation7 + $0x130] sm:$0xff]  ;;  %v188_v30 = vld [vmem:[#allocation7 + $0x138] sm:$0xff]  ;;  %1201 = vmatpush3.bf16.msra.mxu0 %v1200_v17  ;;  %v1204_v31 = vpack.c.bf16 %v154_v23, %v153_v21  ;;  %v1206_v32 = vpack.c.bf16 %v172_v28, %v171_v27 }
  0x52   :  { %v1234_v26 = vpack.c.bf16 %v186_v25, %v185_v24  ;;  %1203 = vmatprep.subr.bf16.mxu0 %v1202_v22  ;;  %v155_v33 = vld [vmem:[#allocation7 + $0x30] sm:$0xff]  ;;  %v156_v34 = vld [vmem:[#allocation7 + $0x38] sm:$0xff]  ;;  %v1238_v35 = vpack.c.bf16 %v188_v30, %v187_v29  ;;  %v173_v36 = vld [vmem:[#allocation7 + $0xc0] sm:$0xff] }
  0x53   :  { %1233 = vmatpush3.bf16.msra.mxu1 %v1230_v18  ;;  %v174_v37 = vld [vmem:[#allocation7 + $0xc8] sm:$0xff]  ;;  %v189_v38 = vld [vmem:[#allocation7 + $0x140] sm:$0xff]  ;;  %v1208_v40 = vpack.c.bf16 %v156_v34, %v155_v33  ;;  %v175_v43 = vld [vmem:[#allocation7 + $0xd0] sm:$0xff] }
  0x54   :  { %1235 = vmatprep.subr.bf16.mxu1 %v1234_v26  ;;  %v190_v39 = vld [vmem:[#allocation7 + $0x148] sm:$0xff]  ;;  %v157_v41 = vld [vmem:[#allocation7 + $0x40] sm:$0xff]  ;;  %v1210_v44 = vpack.c.bf16 %v174_v37, %v173_v36  ;;  %v176_v45 = vld [vmem:[#allocation7 + $0xd8] sm:$0xff] }
  0x55   :  { %1205 = vmatpush3.bf16.msra.mxu0 %v1204_v31  ;;  %v158_v42 = vld [vmem:[#allocation7 + $0x48] sm:$0xff]  ;;  %v191_v46 = vld [vmem:[#allocation7 + $0x150] sm:$0xff]  ;;  %v192_v47 = vld [vmem:[#allocation7 + $0x158] sm:$0xff]  ;;  %v1242_v48 = vpack.c.bf16 %v190_v39, %v189_v38  ;;  %v1214_v51 = vpack.c.bf16 %v176_v45, %v175_v43 }
  0x56   :  { %1207 = vmatprep.subr.bf16.mxu0 %v1206_v32  ;;  %v159_v49 = vld [vmem:[#allocation7 + $0x50] sm:$0xff]  ;;  %v1212_v50 = vpack.c.bf16 %v158_v42, %v157_v41  ;;  %v1246_v52 = vpack.c.bf16 %v192_v47, %v191_v46  ;;  %v1639_v53 = vld [vmem:[#allocation4] sm:$0xff]  ;;  %v1641_v54 = vld [vmem:[#allocation4 + $0x8] sm:$0xff] }
  0x57   :  { %1237 = vmatpush3.bf16.msra.mxu1 %v1234_v26  ;;  %v1643_v55 = vld [vmem:[#allocation4 + $0x10] sm:$0xff]  ;;  %v160_v56 = vld [vmem:[#allocation7 + $0x58] sm:$0xff]  ;;  %v102_v57 = vrot.slane %v1639_v53, 7  ;;  %v123_v58 = vrot.slane %v1639_v53, 1  ;;  %v124_v59 = vrot.slane %v1641_v54, 1  ;;  %v103_v60 = vrot.slane %v1641_v54, 7  ;;  %261 = vmatprep.mubr.f32.mxu0 %v1639_v53 }
  0x58   :  { %1239 = vmatprep.subr.bf16.mxu1 %v1238_v35  ;;  %v1649_v61 = vld [vmem:[#allocation4 + $0x18] sm:$0xff]  ;;  %v177_v62 = vld [vmem:[#allocation7 + $0xe0] sm:$0xff]  ;;  %v178_v63 = vld [vmem:[#allocation7 + $0xe8] sm:$0xff]  ;;  %v105_v0 = vrot.slane %v1643_v55, 7  ;;  %v126_v1 = vrot.slane %v1643_v55, 1  ;;  %v1216_v8 = vpack.c.bf16 %v160_v56, %v159_v49 }
  0x59   :  { %1209 = vmatpush3.bf16.msra.mxu0 %v1208_v40  ;;  %v127_v2 = vrot.slane %v1649_v61, 1  ;;  %v106_v3 = vrot.slane %v1649_v61, 7  ;;  %v193_v4 = vld [vmem:[#allocation7 + $0x160] sm:$0xff]  ;;  %v194_v5 = vld [vmem:[#allocation7 + $0x168] sm:$0xff]  ;;  %112 = vst [vmem:[#allocation2] sm:$0xfe] %v102_v57  ;;  %v125_v6 = vsel %vm122_vm0, %v123_v58, %v124_v59  ;;  %v104_v7 = vsel %vm101_vm1, %v102_v57, %v103_v60 }
  0x5a   :  { %1211 = vmatprep.subr.bf16.mxu0 %v1210_v44  ;;  %134 = vst [vmem:[#allocation2 + $0x28] sm:$0x7f] %v124_v59  ;;  %1112 = vmatprep.mubr.f32.mxu1 %v125_v6  ;;  %114 = vst [vmem:[#allocation2 + $0x30] sm:$0xfe] %v105_v0  ;;  %v1218_v11 = vpack.c.bf16 %v178_v63, %v177_v62  ;;  %v161_v12 = vld [vmem:[#allocation7 + $0x60] sm:$0xff]  ;;  %v162_v13 = vld [vmem:[#allocation7 + $0x68] sm:$0xff]  ;;  %v1250_v14 = vpack.c.bf16 %v194_v5, %v193_v4 }
  0x5b   :  { %1241 = vmatpush3.bf16.msra.mxu1 %v1238_v35  ;;  %v128_v9 = vsel %vm122_vm0, %v126_v1, %v127_v2  ;;  %136 = vst [vmem:[#allocation2 + $0x58] sm:$0x7f] %v127_v2  ;;  %v107_v10 = vsel %vm101_vm1, %v105_v0, %v106_v3  ;;  %v179_v15 = vld [vmem:[#allocation7 + $0xf0] sm:$0xff]  ;;  %v180_v16 = vld [vmem:[#allocation7 + $0xf8] sm:$0xff]  ;;  %v1220_v19 = vpack.c.bf16 %v162_v13, %v161_v12  ;;  %v492_v29 = vld [vmem:[#allocation9 + $0x80] sm:$0xff] }
  0x5c   :  { %1243 = vmatprep.subr.bf16.mxu1 %v1242_v48  ;;  %v195_v17 = vld [vmem:[#allocation7 + $0x170] sm:$0xff]  ;;  %v196_v18 = vld [vmem:[#allocation7 + $0x178] sm:$0xff]  ;;  %v1222_v20 = vpack.c.bf16 %v180_v16, %v179_v15  ;;  %v493_v30 = vld [vmem:[#allocation9 + $0x88] sm:$0xff] }
  0x5d   :  { %1213 = vmatpush3.bf16.msra.mxu0 %v1212_v50  ;;  %v163_v21 = vld [vmem:[#allocation7 + $0x70] sm:$0xff]  ;;  %v164_v22 = vld [vmem:[#allocation7 + $0x78] sm:$0xff]  ;;  %v1254_v23 = vpack.c.bf16 %v196_v18, %v195_v17  ;;  %v1258_v31 = vpack.c.bf16 %v493_v30, %v492_v29  ;;  %v476_v32 = vld [vmem:[#allocation9] sm:$0xff] }
  0x5e   :  { %1215 = vmatprep.subr.bf16.mxu0 %v1214_v51  ;;  %v1224_v24 = vpack.c.bf16 %v164_v22, %v163_v21  ;;  %v477_v33 = vld [vmem:[#allocation9 + $0x8] sm:$0xff]  ;;  %v508_v34 = vld [vmem:[#allocation9 + $0x100] sm:$0xff]  ;;  %v494_v38 = vld [vmem:[#allocation9 + $0x90] sm:$0xff] }
  0x5f   :  { %1245 = vmatpush3.bf16.msra.mxu1 %v1242_v48  ;;  %v1260_v35 = vpack.c.bf16 %v477_v33, %v476_v32  ;;  %v509_v36 = vld [vmem:[#allocation9 + $0x108] sm:$0xff]  ;;  %v495_v39 = vld [vmem:[#allocation9 + $0x98] sm:$0xff]  ;;  %v478_v41 = vld [vmem:[#allocation9 + $0x10] sm:$0xff] }
  0x60   :  { %1247 = vmatprep.subr.bf16.mxu1 %v1246_v52  ;;  %v137_v25 = vld [vmem:[#allocation2] sm:$0xff]  ;;  %v1290_v37 = vpack.c.bf16 %v509_v36, %v508_v34  ;;  %v1262_v40 = vpack.c.bf16 %v495_v39, %v494_v38  ;;  %v479_v42 = vld [vmem:[#allocation9 + $0x18] sm:$0xff]  ;;  %v510_v43 = vld [vmem:[#allocation9 + $0x110] sm:$0xff] }
  0x61   :  { %1217 = vmatpush3.bf16.msra.mxu0 %v1216_v8  ;;  %v142_v26 = vld [vmem:[#allocation2 + $0x28] sm:$0xff]  ;;  %v143_v28 = vld [vmem:[#allocation2 + $0x30] sm:$0xff]  ;;  %v1264_v44 = vpack.c.bf16 %v479_v42, %v478_v41  ;;  %v511_v45 = vld [vmem:[#allocation9 + $0x118] sm:$0xff] }
  0x62   :  { %1219 = vmatprep.subr.bf16.mxu0 %v1218_v11  ;;  %v148_v27 = vld [vmem:[#allocation2 + $0x58] sm:$0xff]  ;;  %v1294_v46 = vpack.c.bf16 %v511_v45, %v510_v43  ;;  %v496_v47 = vld [vmem:[#allocation9 + $0xa0] sm:$0xff]  ;;  %v497_v48 = vld [vmem:[#allocation9 + $0xa8] sm:$0xff] }
  0x63   :  { %1249 = vmatpush3.bf16.msra.mxu1 %v1246_v52  ;;  %v1266_v49 = vpack.c.bf16 %v497_v48, %v496_v47  ;;  %v480_v50 = vld [vmem:[#allocation9 + $0x20] sm:$0xff]  ;;  %v481_v51 = vld [vmem:[#allocation9 + $0x28] sm:$0xff]  ;;  %v498_v59 = vld [vmem:[#allocation9 + $0xb0] sm:$0xff] }
  0x64   :  { %1251 = vmatprep.subr.bf16.mxu1 %v1250_v14  ;;  %v512_v52 = vld [vmem:[#allocation9 + $0x120] sm:$0xff]  ;;  %v1268_v56 = vpack.c.bf16 %v481_v51, %v480_v50  ;;  %v513_v57 = vld [vmem:[#allocation9 + $0x128] sm:$0xff]  ;;  %v499_v60 = vld [vmem:[#allocation9 + $0xb8] sm:$0xff] }
  0x65   :  { %1221 = vmatpush3.bf16.msra.mxu0 %v1220_v19  ;;  %v1298_v58 = vpack.c.bf16 %v513_v57, %v512_v52  ;;  %v1270_v62 = vpack.c.bf16 %v499_v60, %v498_v59  ;;  %v482_v63 = vld [vmem:[#allocation9 + $0x30] sm:$0xff]  ;;  %v483_v0 = vld [vmem:[#allocation9 + $0x38] sm:$0xff]  ;;  %v500_v5 = vld [vmem:[#allocation9 + $0xc0] sm:$0xff] }
  0x66   :  { %1223 = vmatprep.subr.bf16.mxu0 %v1222_v20  ;;  %v1272_v1 = vpack.c.bf16 %v483_v0, %v482_v63  ;;  %v514_v2 = vld [vmem:[#allocation9 + $0x130] sm:$0xff]  ;;  %v515_v3 = vld [vmem:[#allocation9 + $0x138] sm:$0xff]  ;;  %v501_v6 = vld [vmem:[#allocation9 + $0xc8] sm:$0xff] }
  0x67   :  { %1253 = vmatpush3.bf16.msra.mxu1 %v1250_v14  ;;  %v1302_v4 = vpack.c.bf16 %v515_v3, %v514_v2  ;;  %v484_v8 = vld [vmem:[#allocation9 + $0x40] sm:$0xff]  ;;  %v517_v12 = vld [vmem:[#allocation9 + $0x148] sm:$0xff]  ;;  %v502_v14 = vld [vmem:[#allocation9 + $0xd0] sm:$0xff] }
  0x68   :  { %1255 = vmatprep.subr.bf16.mxu1 %v1254_v23  ;;  %v503_v15 = vld [vmem:[#allocation9 + $0xd8] sm:$0xff]  ;;  %v486_v17 = vld [vmem:[#allocation9 + $0x50] sm:$0xff]  ;;  %v521_v30 = vld [vmem:[#allocation9 + $0x168] sm:$0xff] }
  0x69   :  { %1225 = vmatpush3.bf16.msra.mxu0 %v1224_v24  ;;  %v1278_v16 = vpack.c.bf16 %v503_v15, %v502_v14  ;;  %v487_v18 = vld [vmem:[#allocation9 + $0x58] sm:$0xff]  ;;  %v518_v19 = vld [vmem:[#allocation9 + $0x150] sm:$0xff]  ;;  %v505_v24 = vld [vmem:[#allocation9 + $0xe8] sm:$0xff] }
  0x6a   :  { %1259 = vmatprep.subr.bf16.mxu0 %v1258_v31  ;;  %v1280_v20 = vpack.c.bf16 %v487_v18, %v486_v17  ;;  %v519_v21 = vld [vmem:[#allocation9 + $0x158] sm:$0xff]  ;;  %v506_v32 = vld [vmem:[#allocation9 + $0xf0] sm:$0xff]  ;;  %v748_v41 = vld [vmem:[#allocation10 + $0x8] sm:$0xff] }
  0x6b   :  { %1257 = vmatpush3.bf16.msra.mxu1 %v1254_v23  ;;  %v1310_v22 = vpack.c.bf16 %v519_v21, %v518_v19  ;;  %v504_v23 = vld [vmem:[#allocation9 + $0xe0] sm:$0xff]  ;;  %v507_v33 = vld [vmem:[#allocation9 + $0xf8] sm:$0xff] }
  0x6c   :  { %262 = vmatmul.mubr.f32.vlgmr.msra.gmra.mrb[0].mxu0 %v137_v25  ;;  %1291 = vmatprep.subr.bf16.mxu1 %v1290_v37  ;;  %v1282_v25 = vpack.c.bf16 %v505_v24, %v504_v23  ;;  %v1286_v34 = vpack.c.bf16 %v507_v33, %v506_v32  ;;  %v491_v36 = vld [vmem:[#allocation9 + $0x78] sm:$0xff]  ;;  %v393_v33 = vld [vmem:[%s1738_s2] sm:$0x1] }
  0x6d   :  { %266 = vmatprep.mubr.f32.mxu0 %v1641_v54  ;;  %1261 = vmatpush3.bf16.msra.mxu0 %v1260_v35  ;;  %v490_v35 = vld [vmem:[#allocation9 + $0x70] sm:$0xff]  ;;  %v523_v39 = vld [vmem:[#allocation9 + $0x178] sm:$0xff] }
  0x6e   :  { %1113 = vmatmul.mubr.f32.vlgmr.msra.gmra.mrb[0].mxu1 %v142_v26  ;;  %1263 = vmatprep.subr.bf16.mxu0 %v1262_v40  ;;  %v488_v26 = vld [vmem:[#allocation9 + $0x60] sm:$0xff]  ;;  %v1288_v38 = vpack.c.bf16 %v491_v36, %v490_v35 }
  0x6f   :  { %1115 = vmatprep.mubr.f32.mxu1 %v128_v9  ;;  %1293 = vmatpush3.bf16.msra.mxu1 %v1290_v37  ;;  %v485_v9 = vld [vmem:[#allocation9 + $0x48] sm:$0xff]  ;;  %v522_v37 = vld [vmem:[#allocation9 + $0x170] sm:$0xff]  ;;  %v747_v40 = vld [vmem:[#allocation10] sm:$0xff] }
  0x70   :  { %267 = vmatmul.mubr.f32.gmra.mrb[2].mxu0 %v104_v7  ;;  %1295 = vmatprep.subr.bf16.mxu1 %v1294_v46  ;;  %v1274_v7 = vpack.c.bf16 %v501_v6, %v500_v5  ;;  %v1276_v11 = vpack.c.bf16 %v485_v9, %v484_v8  ;;  %v1318_v42 = vpack.c.bf16 %v523_v39, %v522_v37  ;;  %v397_v37 = vld [vmem:[%s1739_s3] sm:$0x1] }
  0x71   :  { %271 = vmatprep.mubr.f32.mxu0 %v1643_v55  ;;  %1265 = vmatpush3.bf16.msra.mxu0 %v1264_v44  ;;  %v1663_v43 = vpack.c.bf16 %v748_v41, %v747_v40 }
  0x72   :  { %1116 = vmatmul.mubr.f32.gmra.mrb[2].mxu1 %v148_v27  ;;  %1267 = vmatprep.subr.bf16.mxu0 %v1266_v49  ;;  %v489_v27 = vld [vmem:[#allocation9 + $0x68] sm:$0xff] }
  0x73   :  { %1297 = vmatpush3.bf16.msra.mxu1 %v1294_v46  ;;  %v1284_v29 = vpack.c.bf16 %v489_v27, %v488_v26 }
  0x74   :  { %272 = vmatmul.mubr.f32.gmra.mrb[4].mxu0 %v143_v28  ;;  %1299 = vmatprep.subr.bf16.mxu1 %v1298_v58  ;;  %v520_v28 = vld [vmem:[#allocation9 + $0x160] sm:$0xff] }
  0x75   :  { %276 = vmatprep.mubr.f32.mxu0 %v1649_v61  ;;  %1269 = vmatpush3.bf16.msra.mxu0 %v1268_v56  ;;  %v1314_v31 = vpack.c.bf16 %v521_v30, %v520_v28 }
  0x76   :  { %1271 = vmatprep.subr.bf16.mxu0 %v1270_v62 }
  0x77   :  { %1301 = vmatpush3.bf16.msra.mxu1 %v1298_v58 }
  0x78   :  { %277 = vmatmul.mubr.f32.gmra.mrb[6].mxu0 %v107_v10  ;;  %1303 = vmatprep.subr.bf16.mxu1 %v1302_v4  ;;  %v516_v10 = vld [vmem:[#allocation9 + $0x140] sm:$0xff] }
  0x79   :  { %1273 = vmatpush3.bf16.msra.mxu0 %v1272_v1  ;;  %v1306_v13 = vpack.c.bf16 %v517_v12, %v516_v10 }
  0x7a   :  { %1275 = vmatprep.subr.bf16.mxu0 %v1274_v7 }
  0x7b   :  { %1305 = vmatpush3.bf16.msra.mxu1 %v1302_v4 }
  0x7c   :  { %1307 = vmatprep.subr.bf16.mxu1 %v1306_v13 }
  0x7d   :  { %1277 = vmatpush3.bf16.msra.mxu0 %v1276_v11 }
  0x7e   :  { %1279 = vmatprep.subr.bf16.mxu0 %v1278_v16 }
  0x7f   :  { %1309 = vmatpush3.bf16.msra.mxu1 %v1306_v13 }
  0x80   :  { %1311 = vmatprep.subr.bf16.mxu1 %v1310_v22 }
  0x81   :  { %1281 = vmatpush3.bf16.msra.mxu0 %v1280_v20 }
  0x82   :  { %1283 = vmatprep.subr.bf16.mxu0 %v1282_v25 }
  0x83   :  { %1313 = vmatpush3.bf16.msra.mxu1 %v1310_v22 }
  0x84   :  { %1315 = vmatprep.subr.bf16.mxu1 %v1314_v31 }
  0x85   :  { %1285 = vmatpush3.bf16.msra.mxu0 %v1284_v29 }
  0x86   :  { %1287 = vmatprep.subr.bf16.mxu0 %v1286_v34 }
  0x87   :  { %1317 = vmatpush3.bf16.msra.mxu1 %v1314_v31  ;;  %v401_v31 = vlaneseq }
  0x88   :  { %1319 = vmatprep.subr.bf16.mxu1 %v1318_v42 }
  0x89   :  { %1289 = vmatpush3.bf16.msra.mxu0 %v1288_v38  ;;  %v402_v32 = vshrl.u32 %v401_v31, 7 }
  0x8a   :  { %1323 = vmatprep.subr.bf16.mxu0 %v1663_v43 }
  0x8b   :  { %1321 = vmatpush3.bf16.msra.mxu1 %v1318_v42  ;;  %v1670_v34 = vsub.s32 0, %v402_v32 }
  0x8c   :  { %1354 = vmatprep.subr.bf16.mxu1 %v1663_v43 }
 0x13f   :  { %v964_v44 = vpop.f32.mrb[0].mxu0 }
 0x140   :  { %v965_v45 = vpop.f32.mrb[1].mxu0 }
 0x141   :  { %v1114_v46 = vpop.f32.mrb[0].mxu1  ;;  %v966_v47 = vadd.f32 %v965_v45, %v964_v44 }
 0x142   :  { %v348_v48 = vpop.f32.mrb[1].mxu1 }
 0x143   :  { %v349_v49 = vadd.f32 %v966_v47, %v348_v48  ;;  %v967_v50 = vpop.f32.mrb[2].mxu0 }
 0x144   :  { %v968_v51 = vpop.f32.mrb[3].mxu0 }
 0x145   :  { %v1117_v52 = vpop.f32.mrb[2].mxu1  ;;  %v969_v56 = vadd.f32 %v968_v51, %v967_v50  ;;  %v376_v62 = vmul.f32 %v349_v49, %v349_v49 }
 0x146   :  { %v358_v57 = vpop.f32.mrb[3].mxu1 }
 0x147   :  { %v354_v58 = vadd.f32 %v1114_v46, %v969_v56  ;;  %v970_v59 = vpop.f32.mrb[4].mxu0 }
 0x148   :  { %v971_v60 = vpop.f32.mrb[5].mxu0 }
 0x149   :  { %v377_v63 = vmul.f32 %v354_v58, %v354_v58  ;;  %v972_v0 = vadd.f32 %v971_v60, %v970_v59  ;;  %v367_v1 = vadd.f32 %v354_v58, %v349_v49 }
 0x14b   :  { %v359_v2 = vadd.f32 %v972_v0, %v358_v57  ;;  %v380_v3 = vadd.f32 %v377_v63, %v376_v62  ;;  %v973_v4 = vpop.f32.mrb[6].mxu0 }
 0x14c   :  { %v974_v5 = vpop.f32.mrb[7].mxu0 }
 0x14d   :  { %v368_v6 = vadd.f32 %v367_v1, %v359_v2  ;;  %v378_v7 = vmul.f32 %v359_v2, %v359_v2  ;;  %v975_v8 = vadd.f32 %v974_v5, %v973_v4 }
 0x14f   :  { %v381_v9 = vadd.f32 %v380_v3, %v378_v7  ;;  %v364_v10 = vadd.f32 %v1117_v52, %v975_v8  ;;  %v749_v7 = vld [vmem:[#allocation10 + $0x10] sm:$0xff]  ;;  %v750_v8 = vld [vmem:[#allocation10 + $0x18] sm:$0xff] }
 0x151   :  { %v369_v11 = vadd.f32 %v368_v6, %v364_v10  ;;  %v379_v12 = vmul.f32 %v364_v10, %v364_v10 }
 0x153   :  { %v370_v13 = vrot.slane %v369_v11, 4  ;;  %v382_v14 = vadd.f32 %v381_v9, %v379_v12  ;;  %v1326_v9 = vpack.c.bf16 %v750_v8, %v749_v7  ;;  %v752_v12 = vld [vmem:[#allocation10 + $0x28] sm:$0xff] }
 0x155   :  { %v371_v15 = vadd.f32 %v370_v13, %v369_v11  ;;  %v383_v16 = vrot.slane %v382_v14, 4  ;;  %v751_v11 = vld [vmem:[#allocation10 + $0x20] sm:$0xff] }
 0x157   :  { %v372_v17 = vrot.slane %v371_v15, 2  ;;  %v384_v18 = vadd.f32 %v383_v16, %v382_v14  ;;  %v1330_v14 = vpack.c.bf16 %v752_v12, %v751_v11  ;;  %v754_v16 = vld [vmem:[#allocation10 + $0x38] sm:$0xff] }
 0x159   :  { %v373_v19 = vadd.f32 %v372_v17, %v371_v15  ;;  %v385_v20 = vrot.slane %v384_v18, 2  ;;  %v753_v15 = vld [vmem:[#allocation10 + $0x30] sm:$0xff] }
 0x15b   :  { %v374_v21 = vrot.slane %v373_v19, 1  ;;  %v386_v22 = vadd.f32 %v385_v20, %v384_v18  ;;  %v1334_v18 = vpack.c.bf16 %v754_v16, %v753_v15  ;;  %v755_v20 = vld [vmem:[#allocation10 + $0x40] sm:$0xff] }
 0x15d   :  { %v375_v23 = vadd.f32 %v374_v21, %v373_v19  ;;  %v387_v24 = vrot.slane %v386_v22, 1  ;;  %v756_v21 = vld [vmem:[#allocation10 + $0x48] sm:$0xff] }
 0x15f   :  { %v388_v25 = vadd.f32 %v387_v24, %v386_v22  ;;  %v389_v26 = vmul.f32 0.03125, %v375_v23  ;;  %v757_v22 = vld [vmem:[#allocation10 + $0x50] sm:$0xff]  ;;  %v758_v23 = vld [vmem:[#allocation10 + $0x58] sm:$0xff] }
 0x160   :  { %v1342_v24 = vpack.c.bf16 %v758_v23, %v757_v22 }
 0x161   :  { %v390_v27 = vmul.f32 0.03125, %v388_v25  ;;  %v391_v28 = vmul.f32 %v389_v26, %v389_v26  ;;  %v759_v25 = vld [vmem:[#allocation10 + $0x60] sm:$0xff] }
 0x163   :  { %v392_v29 = vsub.f32 %v390_v27, %v391_v28  ;;  %v761_v27 = vld [vmem:[#allocation10 + $0x70] sm:$0xff]  ;;  %v762_v28 = vld [vmem:[#allocation10 + $0x78] sm:$0xff] }
 0x165   :  { %v394_v30 = vadd.f32 1e-05, %v392_v29  ;;  %v1350_v29 = vpack.c.bf16 %v762_v28, %v761_v27 }
 0x167   :  { %1378 = vrsqrt.f32 %v394_v30 }
 0x171   :  { %v1379_v35 = vpop.eup %1378 }
 0x172   :  { %v396_v36 = vmul.f32 %v1379_v35, %v393_v33 }
 0x174   :  { %v398_v38 = vmul.f32 %v396_v36, %v389_v26  ;;  %v404_v39 = vrot.slane %v396_v36, %v1670_v34  ;;  %v760_v26 = vld [vmem:[#allocation10 + $0x68] sm:$0xff] }
 0x176   :  { %v399_v40 = vsub.f32 %v397_v37, %v398_v38  ;;  %v406_v41 = vmul.f32 %v404_v39, %v349_v49  ;;  %v407_v42 = vmul.f32 %v404_v39, %v354_v58  ;;  %v408_v44 = vmul.f32 %v404_v39, %v359_v2 }
 0x177   :  { %v409_v45 = vmul.f32 %v404_v39, %v364_v10 }
 0x178   :  { %v414_v46 = vrot.slane %v399_v40, %v1670_v34 }
 0x17a   :  { %v416_v47 = vadd.f32 %v414_v46, %v406_v41  ;;  %v417_v48 = vadd.f32 %v414_v46, %v407_v42  ;;  %v418_v50 = vadd.f32 %v414_v46, %v408_v44  ;;  %v419_v51 = vadd.f32 %v414_v46, %v409_v45 }
 0x17c   :  { %v420_v52 = vmax.f32 %v416_v47, 0.0  ;;  %v421_v56 = vmax.f32 %v417_v48, 0.0  ;;  %v422_v57 = vmax.f32 %v418_v50, 0.0  ;;  %v423_v59 = vmax.f32 %v419_v51, 0.0 }
 0x17e   :  { %v436_v60 = vrot.slane %v420_v52, 7  ;;  %v437_v62 = vrot.slane %v421_v56, 7  ;;  %v439_v63 = vrot.slane %v422_v57, 7  ;;  %v440_v0 = vrot.slane %v423_v59, 7  ;;  %588 = vmatprep.mubr.f32.mxu0 %v420_v52 }
 0x17f   :  { %v450_v1 = vrot.slane %v420_v52, 1  ;;  %v451_v49 = vrot.slane %v421_v56, 1  ;;  %v453_v58 = vrot.slane %v422_v57, 1  ;;  %v454_v2 = vrot.slane %v423_v59, 1 }
 0x180   :  { %v438_v3 = vsel %vm101_vm1, %v436_v60, %v437_v62  ;;  %v441_v4 = vsel %vm101_vm1, %v439_v63, %v440_v0  ;;  %446 = vst [vmem:[#allocation3] sm:$0xfe] %v436_v60  ;;  %448 = vst [vmem:[#allocation3 + $0x30] sm:$0xfe] %v439_v63 }
 0x181   :  { %v452_v5 = vsel %vm122_vm0, %v450_v1, %v451_v49  ;;  %v455_v6 = vsel %vm122_vm0, %v453_v58, %v454_v2  ;;  %461 = vst [vmem:[#allocation3 + $0x28] sm:$0x7f] %v451_v49  ;;  %463 = vst [vmem:[#allocation3 + $0x58] sm:$0x7f] %v454_v2 }
 0x182   :  { %1150 = vmatprep.mubr.f32.mxu1 %v452_v5 }
 0x187   :  { %v464_v10 = vld [vmem:[#allocation3] sm:$0xff]  ;;  %v470_v19 = vld [vmem:[#allocation3 + $0x30] sm:$0xff] }
 0x188   :  { %589 = vmatmul.mubr.f32.vlgmr.msra.gmra.mrb[8].mxu0 %v464_v10  ;;  %v469_v13 = vld [vmem:[#allocation3 + $0x28] sm:$0xff]  ;;  %v475_v17 = vld [vmem:[#allocation3 + $0x58] sm:$0xff] }
 0x189   :  { %1325 = vmatpush3.bf16.msra.mxu0 %v1663_v43  ;;  %593 = vmatprep.mubr.f32.mxu0 %v421_v56 }
 0x18a   :  { %1151 = vmatmul.mubr.f32.vlgmr.msra.gmra.mrb[4].mxu1 %v469_v13  ;;  %1327 = vmatprep.subr.bf16.mxu0 %v1326_v9 }
 0x18b   :  { %1362 = vmatpush3.bf16.msra.mxu1 %v1663_v43  ;;  %1153 = vmatprep.mubr.f32.mxu1 %v455_v6  ;;  %v1338_v43 = vpack.c.bf16 %v756_v21, %v755_v20 }
 0x18c   :  { %594 = vmatmul.mubr.f32.gmra.mrb[10].mxu0 %v438_v3  ;;  %1355 = vmatprep.subr.bf16.mxu1 %v1326_v9 }
 0x18d   :  { %1329 = vmatpush3.bf16.msra.mxu0 %v1326_v9  ;;  %598 = vmatprep.mubr.f32.mxu0 %v422_v57 }
 0x18e   :  { %1154 = vmatmul.mubr.f32.gmra.mrb[6].mxu1 %v475_v17  ;;  %1331 = vmatprep.subr.bf16.mxu0 %v1330_v14 }
 0x18f   :  { %1363 = vmatpush3.bf16.msra.mxu1 %v1326_v9  ;;  %1191 = vmatprep.mubr.f32.mxu1 %v1643_v55  ;;  %v1346_v55 = vpack.c.bf16 %v760_v26, %v759_v25 }
 0x190   :  { %599 = vmatmul.mubr.f32.gmra.mrb[12].mxu0 %v470_v19  ;;  %1356 = vmatprep.subr.bf16.mxu1 %v1330_v14 }
 0x191   :  { %1333 = vmatpush3.bf16.msra.mxu0 %v1330_v14  ;;  %603 = vmatprep.mubr.f32.mxu0 %v423_v59 }
 0x192   :  { %1335 = vmatprep.subr.bf16.mxu0 %v1334_v18 }
 0x193   :  { %1364 = vmatpush3.bf16.msra.mxu1 %v1330_v14 }
 0x194   :  { %604 = vmatmul.mubr.f32.gmra.mrb[14].mxu0 %v441_v4  ;;  %1357 = vmatprep.subr.bf16.mxu1 %v1334_v18 }
 0x195   :  { %1337 = vmatpush3.bf16.msra.mxu0 %v1334_v18  ;;  %1188 = vmatprep.mubr.f32.mxu0 %v1639_v53 }
 0x196   :  { %1339 = vmatprep.subr.bf16.mxu0 %v1338_v43 }
 0x197   :  { %1365 = vmatpush3.bf16.msra.mxu1 %v1334_v18 }
 0x198   :  { %1358 = vmatprep.subr.bf16.mxu1 %v1338_v43 }
 0x199   :  { %1341 = vmatpush3.bf16.msra.mxu0 %v1338_v43 }
 0x19a   :  { %1343 = vmatprep.subr.bf16.mxu0 %v1342_v24 }
 0x19b   :  { %1366 = vmatpush3.bf16.msra.mxu1 %v1338_v43 }
 0x19c   :  { %1359 = vmatprep.subr.bf16.mxu1 %v1342_v24 }
 0x19d   :  { %1345 = vmatpush3.bf16.msra.mxu0 %v1342_v24 }
 0x19e   :  { %1347 = vmatprep.subr.bf16.mxu0 %v1346_v55 }
 0x19f   :  { %1367 = vmatpush3.bf16.msra.mxu1 %v1342_v24 }
 0x1a0   :  { %1360 = vmatprep.subr.bf16.mxu1 %v1346_v55 }
 0x1a1   :  { %1349 = vmatpush3.bf16.msra.mxu0 %v1346_v55 }
 0x1a2   :  { %1351 = vmatprep.subr.bf16.mxu0 %v1350_v29 }
 0x1a3   :  { %1368 = vmatpush3.bf16.msra.mxu1 %v1346_v55 }
 0x1a4   :  { %1361 = vmatprep.subr.bf16.mxu1 %v1350_v29 }
 0x1a5   :  { %1353 = vmatpush3.bf16.msra.mxu0 %v1350_v29 }
 0x1a7   :  { %1369 = vmatpush3.bf16.msra.mxu1 %v1350_v29 }
 0x1a8   :  { %1189 = vmatmul.mubr.f32.vlgmr.msra.gmra.mrb[16].mxu0 %v1641_v54 }
 0x1aa   :  { %1192 = vmatmul.mubr.f32.vlgmr.msra.gmra.mrb[8].mxu1 %v1649_v61 }
 0x25b   :  { %v1028_v53 = vpop.f32.mrb[8].mxu0 }
 0x25c   :  { %v1029_v30 = vpop.f32.mrb[9].mxu0 }
 0x25d   :  { %v1030_v31 = vadd.f32 %v1029_v30, %v1028_v53  ;;  %v1152_v32 = vpop.f32.mrb[4].mxu1 }
 0x25e   :  { %v675_v33 = vpop.f32.mrb[5].mxu1 }
 0x25f   :  { %v1687_v35 = vadd.f32 %v1030_v31, %v675_v33  ;;  %v1031_v36 = vpop.f32.mrb[10].mxu0 }
 0x260   :  { %v1032_v37 = vpop.f32.mrb[11].mxu0 }
 0x261   :  { %v1033_v38 = vadd.f32 %v1032_v37, %v1031_v36  ;;  %v1155_v39 = vpop.f32.mrb[6].mxu1  ;;  %v703_v54 = vmul.f32 %v1687_v35, %v1687_v35  ;;  %v720_v36 = vld [vmem:[%s1741_s5] sm:$0x1] }
 0x262   :  { %v685_v40 = vpop.f32.mrb[7].mxu1 }
 0x263   :  { %v1689_v41 = vadd.f32 %v1152_v32, %v1033_v38  ;;  %v1034_v42 = vpop.f32.mrb[12].mxu0 }
 0x264   :  { %v1035_v44 = vpop.f32.mrb[13].mxu0 }
 0x265   :  { %v694_v61 = vadd.f32 %v1689_v41, %v1687_v35  ;;  %v704_v45 = vmul.f32 %v1689_v41, %v1689_v41  ;;  %v1036_v46 = vadd.f32 %v1035_v44, %v1034_v42 }
 0x267   :  { %v707_v47 = vadd.f32 %v704_v45, %v703_v54  ;;  %v1697_v48 = vadd.f32 %v1036_v46, %v685_v40  ;;  %v1037_v50 = vpop.f32.mrb[14].mxu0  ;;  %v724_v54 = vld [vmem:[%s1742_s6] sm:$0x1] }
 0x268   :  { %v1038_v51 = vpop.f32.mrb[15].mxu0 }
 0x269   :  { %v695_v52 = vadd.f32 %v694_v61, %v1697_v48  ;;  %v705_v56 = vmul.f32 %v1697_v48, %v1697_v48  ;;  %v1039_v57 = vadd.f32 %v1038_v51, %v1037_v50 }
 0x26b   :  { %v708_v59 = vadd.f32 %v707_v47, %v705_v56  ;;  %v691_v60 = vadd.f32 %v1155_v39, %v1039_v57 }
 0x26d   :  { %v696_v62 = vadd.f32 %v695_v52, %v691_v60  ;;  %v706_v63 = vmul.f32 %v691_v60, %v691_v60 }
 0x26f   :  { %v697_v0 = vrot.slane %v696_v62, 4  ;;  %v709_v1 = vadd.f32 %v708_v59, %v706_v63 }
 0x271   :  { %v698_v49 = vadd.f32 %v697_v0, %v696_v62  ;;  %v710_v58 = vrot.slane %v709_v1, 4 }
 0x273   :  { %v699_v2 = vrot.slane %v698_v49, 2  ;;  %v711_v3 = vadd.f32 %v710_v58, %v709_v1 }
 0x275   :  { %v700_v4 = vadd.f32 %v699_v2, %v698_v49  ;;  %v712_v5 = vrot.slane %v711_v3, 2 }
 0x277   :  { %v701_v6 = vrot.slane %v700_v4, 1  ;;  %v713_v7 = vadd.f32 %v712_v5, %v711_v3 }
 0x279   :  { %v702_v8 = vadd.f32 %v701_v6, %v700_v4  ;;  %v714_v9 = vrot.slane %v713_v7, 1  ;;  %v874_v4 = vld [vmem:[%s1744_s8] sm:$0x1]  ;;  %s1509_s8 = smov [#allocation12]  }
 0x27a   :  { %s918_s11 = sshll.u32 %s1509_s8, 4  ;;  %s919_s11 = int_to_ptr.vmem [resolvable:$true] %s918_s11 }
 0x27b   :  { %v715_v10 = vadd.f32 %v714_v9, %v713_v7  ;;  %v716_v11 = vmul.f32 0.03125, %v702_v8  ;;  %v1190_v12 = vpop.f32.mrb[16].mxu0  ;;  %p1477_p5 = scmp.lt.s32.totalorder %s919_s11, %s919_s11 }
 0x27c   :  { %v858_v13 = vmul.f32 %v1190_v12, %v1190_v12  ;;  %v829_v14 = vpop.f32.mrb[17].mxu0 }
 0x27d   :  { %v717_v15 = vmul.f32 0.03125, %v715_v10  ;;  %v718_v16 = vmul.f32 %v716_v11, %v716_v11  ;;  %v848_v17 = vadd.f32 %v1190_v12, %v829_v14  ;;  %v857_v18 = vmul.f32 %v829_v14, %v829_v14  ;;  %v1193_v19 = vpop.f32.mrb[8].mxu1 }
 0x27e   :  { %v839_v20 = vpop.f32.mrb[9].mxu1  ;;  %v860_v25 = vmul.f32 %v1193_v19, %v1193_v19 }
 0x27f   :  { %v719_v21 = vsub.f32 %v717_v15, %v718_v16  ;;  %v861_v43 = vadd.f32 %v858_v13, %v857_v18  ;;  %v849_v22 = vadd.f32 %v848_v17, %v839_v20  ;;  %v859_v23 = vmul.f32 %v839_v20, %v839_v20 }
 0x281   :  { %v721_v24 = vadd.f32 1e-05, %v719_v21  ;;  %v850_v26 = vadd.f32 %v1193_v19, %v849_v22  ;;  %v862_v55 = vadd.f32 %v861_v43, %v859_v23 }
 0x283   :  { %1380 = vrsqrt.f32 %v721_v24  ;;  %v851_v27 = vrot.slane %v850_v26, 4  ;;  %v863_v28 = vadd.f32 %v862_v55, %v860_v25 }
 0x285   :  { %v852_v29 = vadd.f32 %v851_v27, %v850_v26  ;;  %v864_v53 = vrot.slane %v863_v28, 4 }
 0x287   :  { %v853_v30 = vrot.slane %v852_v29, 2  ;;  %v865_v31 = vadd.f32 %v864_v53, %v863_v28 }
 0x289   :  { %v854_v32 = vadd.f32 %v853_v30, %v852_v29  ;;  %v866_v33 = vrot.slane %v865_v31, 2 }
 0x28b   :  { %v855_v37 = vrot.slane %v854_v32, 1  ;;  %v867_v38 = vadd.f32 %v866_v33, %v865_v31 }
 0x28d   :  { %v1381_v39 = vpop.eup %1380  ;;  %v856_v40 = vadd.f32 %v855_v37, %v854_v32  ;;  %v868_v42 = vrot.slane %v867_v38, 1 }
 0x28e   :  { %v723_v44 = vmul.f32 %v1381_v39, %v720_v36 }
 0x28f   :  { %v869_v61 = vadd.f32 %v868_v42, %v867_v38  ;;  %v870_v45 = vmul.f32 0.03125, %v856_v40 }
 0x290   :  { %v725_v46 = vmul.f32 %v723_v44, %v716_v11  ;;  %v731_v47 = vrot.slane %v723_v44, %v1670_v34 }
 0x291   :  { %v871_v50 = vmul.f32 0.03125, %v869_v61  ;;  %v872_v51 = vmul.f32 %v870_v45, %v870_v45 }
 0x292   :  { %v726_v52 = vsub.f32 %v724_v54, %v725_v46  ;;  %v736_v56 = vmul.f32 %v731_v47, %v691_v60  ;;  %v735_v57 = vmul.f32 %v731_v47, %v1697_v48  ;;  %v733_v59 = vmul.f32 %v731_v47, %v1687_v35  ;;  %v878_v35 = vld [vmem:[%s1745_s9] sm:$0x1]  ;;  %s1472_s9 = scalar_lea.vmem %s919_s11, 512 }
 0x293   :  { %v873_v62 = vsub.f32 %v871_v50, %v872_v51  ;;  %v734_v63 = vmul.f32 %v731_v47, %v1689_v41  ;;  %p1473_p4 = scmp.ne.s32.totalorder %s919_s11, %s1472_s9  ;;  %p1478_p6 = scmp.lt.s32.totalorder %s1472_s9, %s1472_s9 }
 0x294   :  { %v741_v0 = vrot.slane %v726_v52, %v1670_v34 }
 0x295   :  { %v875_v1 = vadd.f32 1e-05, %v873_v62  ;;  %p1479_p7 = por %p1478_p6, %p1477_p5 }
 0x296   :  { %v746_v49 = vadd.f32 %v741_v0, %v736_v56  ;;  %v745_v58 = vadd.f32 %v741_v0, %v735_v57  ;;  %v743_v2 = vadd.f32 %v741_v0, %v733_v59  ;;  %v744_v3 = vadd.f32 %v741_v0, %v734_v63 }
 0x297   :  { %1382 = vrsqrt.f32 %v875_v1  ;;  %p1480_p8 = pnand %p1479_p7, %p1473_p4 }
 0x2a1   :  { %v1383_v60 = vpop.eup %1382 }
 0x2a2   :  { %v877_v5 = vmul.f32 %v1383_v60, %v874_v4 }
 0x2a4   :  { %v879_v48 = vmul.f32 %v877_v5, %v870_v45  ;;  %v885_v41 = vrot.slane %v877_v5, %v1670_v34 }
 0x2a6   :  { %v880_v6 = vsub.f32 %v878_v35, %v879_v48  ;;  %v889_v7 = vmul.f32 %v885_v41, %v839_v20  ;;  %v887_v8 = vmul.f32 %v885_v41, %v829_v14  ;;  %v888_v9 = vmul.f32 %v1190_v12, %v885_v41 }
 0x2a7   :  { %v890_v10 = vmul.f32 %v1193_v19, %v885_v41 }
 0x2a8   :  { %v895_v11 = vrot.slane %v880_v6, %v1670_v34 }
 0x2aa   :  { %v899_v13 = vadd.f32 %v895_v11, %v889_v7  ;;  %v897_v15 = vadd.f32 %v895_v11, %v887_v8  ;;  %v898_v16 = vadd.f32 %v895_v11, %v888_v9  ;;  %v900_v17 = vadd.f32 %v895_v11, %v890_v10 }
 0x2ac   :  { %v903_v18 = vadd.f32 %v899_v13, %v745_v58  ;;  %v901_v21 = vadd.f32 %v897_v15, %v743_v2  ;;  %v902_v43 = vadd.f32 %v898_v16, %v744_v3  ;;  %v904_v22 = vadd.f32 %v900_v17, %v746_v49 }
 0x2ae   :  { %v907_v23 = vmax.f32 %v903_v18, 0.0  ;;  %v905_v24 = vmax.f32 %v901_v21, 0.0  ;;  %v906_v25 = vmax.f32 %v902_v43, 0.0  ;;  %v908_v26 = vmax.f32 %v904_v22, 0.0 }
 0x2b0   :  { %911 = vst [vmem:[#allocation12 + $0x10] sm:$0xff] %v907_v23  ;;  %909 = vst [vmem:[#allocation12] sm:$0xff] %v905_v24 }
 0x2b1   :  { %910 = vst [vmem:[#allocation12 + $0x8] sm:$0xff] %v906_v25  ;;  %912 = vst [vmem:[#allocation12 + $0x18] sm:$0xff] %v908_v26 }
 0x2b2   :  { %1483 = shalt.err (!%p1480_p8)
}
 0x2b3   :  { %s1484_s12 = scalar_lea.hbm %s1746_s10, 512 }
 0x2b4   :  { %p1485_p9 = scmp.ne.s32.totalorder %s1746_s10, %s1484_s12  ;;  %p1488_p10 = scmp.lt.u32.totalorder %s1484_s12, %s1746_s10 }
 0x2b6   :  { %p1490_p11 = pnand %p1488_p10, %p1485_p9 }
 0x2b8   :  { %1493 = shalt.err (!%p1490_p11)
}
 0x2b9   :  { %924 = dma.vmem_to_hbm [thread:$0]  %s919_s11, 512, %s1746_s10, [#allocation6], %s1504_s25, %s1504_s25, %s1505_s26  }
 0x2ba   :  { %1500 = dma.done.wait [#allocation6], 512  }
 0x2bb   :  { %1501 = vsyncadd [#allocation6], 4294966784 }
 0x2bc   :  { %928 = vsyncpa [#allocation5], 1 }
 0x2bd   :  { %929 = vsyncpa [#allocation8], 1 }
 0x2be   :  { %930 = vsyncpa [#allocation11], 1 }
 0x2bf   :  { %931 = vsyncpa [#allocation6], 1 }

</bundles_post_ra>
